<compile_context>
chip_gen: v7x
topology: tpu7x:2x2x1
jax: 0.10.0
libtpu: 0.0.40
codegen_flags: <defaults>
</compile_context>

<pallas_src>
import functools
import math

import jax
import jax.numpy as jnp
from jax import lax
from jax.experimental import pallas as pl
from jax.experimental.pallas import tpu as pltpu


def _round_up(x: int, m: int) -> int:
    return ((x + m - 1) // m) * m


def _cdiv(a: int, b: int) -> int:
    return -(-a // b)


def _pad_to(a, shape):
    pads = [(0, t - s) for s, t in zip(a.shape, shape)]
    if all(p == (0, 0) for p in pads):
        return a
    return jnp.pad(a, pads)


_UNROLL_MAX_LAYERS = 6   # static unroll for short stacks; fori_loop beyond


def _fcn_kernel(*refs, n_hidden_layers: int):
    if n_hidden_layers > 0:
        (x_ref, w_in_ref, b_in_ref, wh_ref, bh_ref,
         w_out_ref, b_out_ref, o_ref) = refs
    else:
        x_ref, w_in_ref, b_in_ref, w_out_ref, b_out_ref, o_ref = refs
        wh_ref = bh_ref = None

    bf = jnp.bfloat16

    # Input layer: x arrives as f32; cast to bf16 on-chip for the MXU and keep
    # the bias add / ReLU on the f32 accumulator (also v5e-safe: no bf16 VPU).
    h = jnp.dot(x_ref[...].astype(bf), w_in_ref[...],
                preferred_element_type=jnp.float32)
    h = jnp.maximum(h + b_in_ref[...], 0.0)

    if n_hidden_layers > 0:
        if n_hidden_layers <= _UNROLL_MAX_LAYERS:
            # Short stacks: static unroll (best LLO scheduling visibility).
            for l in range(n_hidden_layers):
                h = jnp.dot(h.astype(bf), wh_ref[l],
                            preferred_element_type=jnp.float32)
                h = jnp.maximum(h + bh_ref[l], 0.0)
        else:
            # Deep stacks: bound live ranges / vreg pressure with a loop.
            def body(l, h):
                hl = jnp.dot(h.astype(bf), wh_ref[l],
                             preferred_element_type=jnp.float32)
                return jnp.maximum(hl + bh_ref[l], 0.0)
            h = lax.fori_loop(0, n_hidden_layers, body, h)

    # Output layer: Linear, no activation; store f32 lane-dense block.
    out = jnp.dot(h.astype(bf), w_out_ref[...],
                  preferred_element_type=jnp.float32)
    o_ref[...] = (out + b_out_ref[...]).astype(o_ref.dtype)


def fcn_forward(x, params, *, n_hidden_layers: int, n_outputs: int):
    """Pallas implementation of FCNModule.forward.

    x: (batch, input_size), f32
    params: (w_in, b_in, wh, bh, w_out, b_out) with weights stored (in, out);
            wh/bh may be None when n_hidden_layers == 0.
    returns: (batch, output_size, n_outputs), f32
    """
    w_in, b_in, wh, bh, w_out, b_out = params
    batch, in_size = x.shape
    hidden = w_in.shape[1]
    out_dim = w_out.shape[1]               # output_size * n_outputs

    bf = jnp.bfloat16
    Hp = _round_up(hidden, 128)            # lane-dense hidden width
    Np = _round_up(out_dim, 128)           # lane-dense output width

    # Pad in_size to a lane-dense multiple of 128 only when large & misaligned
    # (padding x columns costs an extra wrapper pass over x, so skip otherwise;
    # a full-extent block is still legal for sub-128 in_size).
    Kp = _round_up(in_size, 128) if (in_size % 128 != 0 and in_size >= 256) \
        else in_size

    # --- Pad + cast parameters once (zero padding is numerically exact). ---
    w_in_p = _pad_to(w_in, (Kp, Hp)).astype(bf)
    b_in_p = _pad_to(b_in, (1, Hp)).astype(jnp.float32)
    w_out_p = _pad_to(w_out, (Hp, Np)).astype(bf)
    b_out_p = _pad_to(b_out, (1, Np)).astype(jnp.float32)
    if n_hidden_layers > 0:
        wh_p = _pad_to(wh, (n_hidden_layers, Hp, Hp)).astype(bf)
        bh_p = _pad_to(bh, (n_hidden_layers, 1, Hp)).astype(jnp.float32)

    # --- Batch tiling: >=2 (even) tiles when batch allows (v7x megacore),
    #     TM picked to minimize last-tile padding waste, multiple of 16. ---
    if batch >= 32:
        n_tiles = max(2, _cdiv(batch, 512))
        if n_tiles % 2:
            n_tiles += 1
        TM = _round_up(_cdiv(batch, n_tiles), 16)
    else:
        TM = _round_up(max(batch, 8), 16)
    grid_m = _cdiv(batch, TM)
    Bp = grid_m * TM
    grid = (grid_m,)

    # x stays f32 (in-kernel bf16 cast); only batch rows / in_size padded.
    x_p = _pad_to(x, (Bp, Kp))

    small_hidden = Hp <= 256               # HBM-bound regime -> deeper x buffering

    def _wspec(a, buffered):
        nd = a.ndim
        if buffered:
            return pl.BlockSpec(a.shape, lambda i: (0,) * nd,
                                pipeline_mode=pl.Buffered(1))
        return pl.BlockSpec(a.shape, lambda i: (0,) * nd)

    def _build(buffered):
        if buffered and small_hidden and grid_m > 1:
            x_spec = pl.BlockSpec((TM, Kp), lambda i: (i, 0),
                                  pipeline_mode=pl.Buffered(3))
            x_bufs = 3
        else:
            x_spec = pl.BlockSpec((TM, Kp), lambda i: (i, 0))
            x_bufs = 2

        in_specs = [x_spec, _wspec(w_in_p, buffered), _wspec(b_in_p, buffered)]
        args = [x_p, w_in_p, b_in_p]
        if n_hidden_layers > 0:
            in_specs += [_wspec(wh_p, buffered), _wspec(bh_p, buffered)]
            args += [wh_p, bh_p]
        in_specs += [_wspec(w_out_p, buffered), _wspec(b_out_p, buffered)]
        args += [w_out_p, b_out_p]

        out_specs = pl.BlockSpec((TM, Np), lambda i: (i, 0))

        # --- Generation-aware VMEM budget: resident weights (x1 or x2 buffers)
        #     + buffered x/out tiles + activation scratch, 1.5x headroom,
        #     capped at ~85% of this chip's VMEM capacity. ---
        try:
            vmem_cap = int(pltpu.get_tpu_info().vmem_capacity_bytes)
        except Exception:
            vmem_cap = 64 << 20            # conservative (v7x per-TC)
        weight_bytes = sum(int(a.size) * a.dtype.itemsize for a in args[1:])
        weight_bytes *= (1 if buffered else 2)
        io_bytes = x_bufs * TM * Kp * 4 + 2 * TM * Np * 4
        act_bytes = 4 * TM * Hp * 4
        needed = weight_bytes + io_bytes + act_bytes
        vmem_limit = int(min(max(int(1.5 * needed), 16 << 20),
                             int(0.85 * vmem_cap)))

        kernel = functools.partial(_fcn_kernel,
                                   n_hidden_layers=n_hidden_layers)
        return pl.pallas_call(
            kernel,
            out_shape=jax.ShapeDtypeStruct((Bp, Np), jnp.float32),
            grid=grid,
            in_specs=in_specs,
            out_specs=out_specs,
            compiler_params=pltpu.CompilerParams(
                dimension_semantics=("parallel",),   # megacore sharding on v7x
                vmem_limit_bytes=vmem_limit),
        ), args

    try:
        call, args = _build(True)
        flat = call(*args)
    except Exception:
        # Fallback: identical kernel without pipeline_mode hints.
        call, args = _build(False)
        flat = call(*args)

    # matches: self.sequential(x).reshape(x.size(0), -1, self.n_outputs)
    return flat[:batch, :out_dim].reshape(batch, -1, n_outputs)


def init_params(key, input_size, hidden_size, output_size, n_hidden_layers,
                n_outputs):
    """Deterministic synthetic parameters, stored as (in, out) matrices."""
    ks = jax.random.split(key, 6)
    scale = 0.1
    w_in = scale * jax.random.normal(ks[0], (input_size, hidden_size), jnp.float32)
    b_in = scale * jax.random.normal(ks[1], (1, hidden_size), jnp.float32)
    if n_hidden_layers > 0:
        wh = scale * jax.random.normal(
            ks[2], (n_hidden_layers, hidden_size, hidden_size), jnp.float32)
        bh = scale * jax.random.normal(
            ks[3], (n_hidden_layers, 1, hidden_size), jnp.float32)
    else:
        wh = bh = None
    w_out = scale * jax.random.normal(
        ks[4], (hidden_size, output_size * n_outputs), jnp.float32)
    b_out = scale * jax.random.normal(
        ks[5], (1, output_size * n_outputs), jnp.float32)
    return w_in, b_in, wh, bh, w_out, b_out


def fcn_reference_f32(x, params, *, n_hidden_layers: int, n_outputs: int):
    """Pure-f32 JAX reference (PyTorch-equivalent semantics)."""
    w_in, b_in, wh, bh, w_out, b_out = params
    h = jnp.maximum(x @ w_in + b_in, 0.0)
    for l in range(n_hidden_layers):
        h = jnp.maximum(h @ wh[l] + bh[l], 0.0)
    out = h @ w_out + b_out
    return out.reshape(x.shape[0], -1, n_outputs)


def fcn_reference_bf16(x, params, *, n_hidden_layers: int, n_outputs: int):
    """Pure-JAX reference mirroring the kernel's numerics (bf16 ops, f32 acc)."""
    w_in, b_in, wh, bh, w_out, b_out = params
    bf = jnp.bfloat16
    h = jnp.dot(x.astype(bf), w_in.astype(bf), preferred_element_type=jnp.float32)
    h = jnp.maximum(h + b_in, 0.0)
    for l in range(n_hidden_layers):
        h = jnp.dot(h.astype(bf), wh[l].astype(bf),
                    preferred_element_type=jnp.float32)
        h = jnp.maximum(h + bh[l], 0.0)
    out = jnp.dot(h.astype(bf), w_out.astype(bf),
                  preferred_element_type=jnp.float32) + b_out
    return out.reshape(x.shape[0], -1, n_outputs)


if __name__ == "__main__":
    # Small shapes consistent with the module's forward.
    batch = 8
    input_size = 16
    hidden_size = 32
    n_hidden_layers = 2
    output_size = 4
    n_outputs = 3

    key = jax.random.PRNGKey(0)
    kx, kp = jax.random.split(key)
    x = jax.random.normal(kx, (batch, input_size), jnp.float32)
    params = init_params(kp, input_size, hidden_size, output_size,
                         n_hidden_layers, n_outputs)

    y = fcn_forward(x, params, n_hidden_layers=n_hidden_layers,
                    n_outputs=n_outputs)
    y = jax.block_until_ready(y)
    assert y.shape == (batch, output_size, n_outputs), y.shape

    # Tight check against a reference with identical bf16/f32 numerics.
    y_bf = fcn_reference_bf16(x, params, n_hidden_layers=n_hidden_layers,
                              n_outputs=n_outputs)
    assert jnp.allclose(y, y_bf, atol=5e-4, rtol=1e-3), \
        "mismatch vs bf16-path reference"

    # Looser check against the pure-f32 (PyTorch-semantics) reference.
    y_f32 = fcn_reference_f32(x, params, n_hidden_layers=n_hidden_layers,
                              n_outputs=n_outputs)
    assert jnp.allclose(y, y_f32, atol=3e-2, rtol=3e-2), \
        "mismatch vs f32 reference"

    print("KERNEL_OK")
</pallas_src>

<mosaic_0001>
module attributes {stable_mosaic.version = 11 : i64} {
  func.func @_fcn_kernel(%arg0: i32, %arg1: memref<16x16xf32, #tpu.memory_space<vmem>>, %arg2: memref<16x128xbf16, #tpu.memory_space<vmem>>, %arg3: memref<1x128xf32, #tpu.memory_space<vmem>>, %arg4: memref<2x128x128xbf16, #tpu.memory_space<vmem>>, %arg5: memref<2x1x128xf32, #tpu.memory_space<vmem>>, %arg6: memref<128x128xbf16, #tpu.memory_space<vmem>>, %arg7: memref<1x128xf32, #tpu.memory_space<vmem>>, %arg8: memref<16x128xf32, #tpu.memory_space<vmem>>) attributes {dimension_semantics = [#tpu.dimension_semantics<parallel>], iteration_bounds = array<i64: 1>, scalar_prefetch = 0 : i64, scratch_operands = 0 : i64, tpu.core_type = #tpu.core_type<tc>, window_params = [{transform_indices = @transform_0, window_bounds = array<i64: 16, 16>}, {pipeline_mode = #tpu.pipeline_mode<synchronous>, transform_indices = @transform_1, window_bounds = array<i64: 16, 128>}, {pipeline_mode = #tpu.pipeline_mode<synchronous>, transform_indices = @transform_2, window_bounds = array<i64: 1, 128>}, {pipeline_mode = #tpu.pipeline_mode<synchronous>, transform_indices = @transform_3, window_bounds = array<i64: 2, 128, 128>}, {pipeline_mode = #tpu.pipeline_mode<synchronous>, transform_indices = @transform_4, window_bounds = array<i64: 2, 1, 128>}, {pipeline_mode = #tpu.pipeline_mode<synchronous>, transform_indices = @transform_5, window_bounds = array<i64: 128, 128>}, {pipeline_mode = #tpu.pipeline_mode<synchronous>, transform_indices = @transform_6, window_bounds = array<i64: 1, 128>}, {transform_indices = @transform_7, window_bounds = array<i64: 16, 128>}]} {
    %c0 = arith.constant 0 : index
    %c0_0 = arith.constant 0 : index
    %0 = vector.load %arg1[%c0, %c0_0] : memref<16x16xf32, #tpu.memory_space<vmem>>, vector<16x16xf32>
    %1 = arith.truncf %0 : vector<16x16xf32> to vector<16x16xbf16>
    %c0_1 = arith.constant 0 : index
    %c0_2 = arith.constant 0 : index
    %2 = vector.load %arg2[%c0_1, %c0_2] : memref<16x128xbf16, #tpu.memory_space<vmem>>, vector<16x128xbf16>
    %cst = arith.constant dense<0.000000e+00> : vector<16x128xf32>
    %3 = tpu.matmul %1, %2, %cst {dimension_numbers = #tpu.dot_dimension_numbers<[1], [0], [0], [1], [0, 0, 1, 1], [], []>} : vector<16x16xbf16>, vector<16x128xbf16>, vector<16x128xf32> -> vector<16x128xf32>
    %c0_3 = arith.constant 0 : index
    %c0_4 = arith.constant 0 : index
    %4 = vector.load %arg3[%c0_3, %c0_4] : memref<1x128xf32, #tpu.memory_space<vmem>>, vector<1x128xf32>
    %5 = vector.broadcast %4 : vector<1x128xf32> to vector<16x128xf32>
    %6 = arith.addf %3, %5 : vector<16x128xf32>
    %cst_5 = arith.constant 0.000000e+00 : f32
    %7 = vector.broadcast %cst_5 : f32 to vector<16x128xf32>
    %8 = arith.maximumf %6, %7 : vector<16x128xf32>
    %9 = arith.truncf %8 : vector<16x128xf32> to vector<16x128xbf16>
    %c0_6 = arith.constant 0 : index
    %c0_7 = arith.constant 0 : index
    %c0_8 = arith.constant 0 : index
    %10 = vector.load %arg4[%c0_6, %c0_7, %c0_8] : memref<2x128x128xbf16, #tpu.memory_space<vmem>>, vector<1x128x128xbf16>
    %11 = vector.shape_cast %10 : vector<1x128x128xbf16> to vector<128x128xbf16>
    %cst_9 = arith.constant dense<0.000000e+00> : vector<16x128xf32>
    %12 = tpu.matmul %9, %11, %cst_9 {dimension_numbers = #tpu.dot_dimension_numbers<[1], [0], [0], [1], [0, 0, 1, 1], [], []>} : vector<16x128xbf16>, vector<128x128xbf16>, vector<16x128xf32> -> vector<16x128xf32>
    %c0_10 = arith.constant 0 : index
    %c0_11 = arith.constant 0 : index
    %c0_12 = arith.constant 0 : index
    %13 = vector.load %arg5[%c0_10, %c0_11, %c0_12] : memref<2x1x128xf32, #tpu.memory_space<vmem>>, vector<1x1x128xf32>
    %14 = vector.shape_cast %13 : vector<1x1x128xf32> to vector<1x128xf32>
    %15 = vector.broadcast %14 : vector<1x128xf32> to vector<16x128xf32>
    %16 = arith.addf %12, %15 : vector<16x128xf32>
    %cst_13 = arith.constant 0.000000e+00 : f32
    %17 = vector.broadcast %cst_13 : f32 to vector<16x128xf32>
    %18 = arith.maximumf %16, %17 : vector<16x128xf32>
    %19 = arith.truncf %18 : vector<16x128xf32> to vector<16x128xbf16>
    %c1 = arith.constant 1 : index
    %c0_14 = arith.constant 0 : index
    %c0_15 = arith.constant 0 : index
    %20 = vector.load %arg4[%c1, %c0_14, %c0_15] : memref<2x128x128xbf16, #tpu.memory_space<vmem>>, vector<1x128x128xbf16>
    %21 = vector.shape_cast %20 : vector<1x128x128xbf16> to vector<128x128xbf16>
    %cst_16 = arith.constant dense<0.000000e+00> : vector<16x128xf32>
    %22 = tpu.matmul %19, %21, %cst_16 {dimension_numbers = #tpu.dot_dimension_numbers<[1], [0], [0], [1], [0, 0, 1, 1], [], []>} : vector<16x128xbf16>, vector<128x128xbf16>, vector<16x128xf32> -> vector<16x128xf32>
    %c1_17 = arith.constant 1 : index
    %c0_18 = arith.constant 0 : index
    %c0_19 = arith.constant 0 : index
    %23 = vector.load %arg5[%c1_17, %c0_18, %c0_19] : memref<2x1x128xf32, #tpu.memory_space<vmem>>, vector<1x1x128xf32>
    %24 = vector.shape_cast %23 : vector<1x1x128xf32> to vector<1x128xf32>
    %25 = vector.broadcast %24 : vector<1x128xf32> to vector<16x128xf32>
    %26 = arith.addf %22, %25 : vector<16x128xf32>
    %cst_20 = arith.constant 0.000000e+00 : f32
    %27 = vector.broadcast %cst_20 : f32 to vector<16x128xf32>
    %28 = arith.maximumf %26, %27 : vector<16x128xf32>
    %29 = arith.truncf %28 : vector<16x128xf32> to vector<16x128xbf16>
    %c0_21 = arith.constant 0 : index
    %c0_22 = arith.constant 0 : index
    %30 = vector.load %arg6[%c0_21, %c0_22] : memref<128x128xbf16, #tpu.memory_space<vmem>>, vector<128x128xbf16>
    %cst_23 = arith.constant dense<0.000000e+00> : vector<16x128xf32>
    %31 = tpu.matmul %29, %30, %cst_23 {dimension_numbers = #tpu.dot_dimension_numbers<[1], [0], [0], [1], [0, 0, 1, 1], [], []>} : vector<16x128xbf16>, vector<128x128xbf16>, vector<16x128xf32> -> vector<16x128xf32>
    %c0_24 = arith.constant 0 : index
    %c0_25 = arith.constant 0 : index
    %32 = vector.load %arg7[%c0_24, %c0_25] : memref<1x128xf32, #tpu.memory_space<vmem>>, vector<1x128xf32>
    %33 = vector.broadcast %32 : vector<1x128xf32> to vector<16x128xf32>
    %34 = arith.addf %31, %33 : vector<16x128xf32>
    %c0_26 = arith.constant 0 : index
    %c0_27 = arith.constant 0 : index
    %35 = vector.load %arg8[%c0_26, %c0_27] : memref<16x128xf32, #tpu.memory_space<vmem>>, vector<16x128xf32>
    tpu.vector_store %arg8[%c0_26, %c0_27], %34 {strides = array<i32>} : memref<16x128xf32, #tpu.memory_space<vmem>>, vector<16x128xf32>,
    return
  }
  func.func @transform_0(%arg0: i32) -> (i32, i32) {
    %c0_i32 = arith.constant 0 : i32
    %c0_i32_0 = arith.constant 0 : i32
    return %arg0, %c0_i32 : i32, i32
  }
  func.func @transform_1(%arg0: i32) -> (i32, i32) {
    %c0_i32 = arith.constant 0 : i32
    %c0_i32_0 = arith.constant 0 : i32
    %c0_i32_1 = arith.constant 0 : i32
    return %c0_i32, %c0_i32_0 : i32, i32
  }
  func.func @transform_2(%arg0: i32) -> (i32, i32) {
    %c0_i32 = arith.constant 0 : i32
    %c0_i32_0 = arith.constant 0 : i32
    %c0_i32_1 = arith.constant 0 : i32
    return %c0_i32, %c0_i32_0 : i32, i32
  }
  func.func @transform_3(%arg0: i32) -> (i32, i32, i32) {
    %c0_i32 = arith.constant 0 : i32
    %c0_i32_0 = arith.constant 0 : i32
    %c0_i32_1 = arith.constant 0 : i32
    %c0_i32_2 = arith.constant 0 : i32
    return %c0_i32, %c0_i32_0, %c0_i32_1 : i32, i32, i32
  }
  func.func @transform_4(%arg0: i32) -> (i32, i32, i32) {
    %c0_i32 = arith.constant 0 : i32
    %c0_i32_0 = arith.constant 0 : i32
    %c0_i32_1 = arith.constant 0 : i32
    %c0_i32_2 = arith.constant 0 : i32
    return %c0_i32, %c0_i32_0, %c0_i32_1 : i32, i32, i32
  }
  func.func @transform_5(%arg0: i32) -> (i32, i32) {
    %c0_i32 = arith.constant 0 : i32
    %c0_i32_0 = arith.constant 0 : i32
    %c0_i32_1 = arith.constant 0 : i32
    return %c0_i32, %c0_i32_0 : i32, i32
  }
  func.func @transform_6(%arg0: i32) -> (i32, i32) {
    %c0_i32 = arith.constant 0 : i32
    %c0_i32_0 = arith.constant 0 : i32
    %c0_i32_1 = arith.constant 0 : i32
    return %c0_i32, %c0_i32_0 : i32, i32
  }
  func.func @transform_7(%arg0: i32) -> (i32, i32) {
    %c0_i32 = arith.constant 0 : i32
    %c0_i32_0 = arith.constant 0 : i32
    return %arg0, %c0_i32 : i32, i32
  }
}

module attributes {stable_mosaic.version = 11 : i64} {
  func.func @_fcn_kernel(%arg0: i32, %arg1: memref<16x16xf32, #tpu.memory_space<vmem>>, %arg2: memref<16x128xbf16, #tpu.memory_space<vmem>>, %arg3: memref<1x128xf32, #tpu.memory_space<vmem>>, %arg4: memref<2x128x128xbf16, #tpu.memory_space<vmem>>, %arg5: memref<2x1x128xf32, #tpu.memory_space<vmem>>, %arg6: memref<128x128xbf16, #tpu.memory_space<vmem>>, %arg7: memref<1x128xf32, #tpu.memory_space<vmem>>, %arg8: memref<16x128xf32, #tpu.memory_space<vmem>>) attributes {dimension_semantics = [#tpu.dimension_semantics<parallel>], iteration_bounds = array<i64: 1>, scalar_prefetch = 0 : i64, scratch_operands = 0 : i64, tpu.core_type = #tpu.core_type<tc>, window_params = [{transform_indices = @transform_0, window_bounds = array<i64: 16, 16>}, {pipeline_mode = #tpu.pipeline_mode<synchronous>, transform_indices = @transform_1, window_bounds = array<i64: 16, 128>}, {pipeline_mode = #tpu.pipeline_mode<synchronous>, transform_indices = @transform_2, window_bounds = array<i64: 1, 128>}, {pipeline_mode = #tpu.pipeline_mode<synchronous>, transform_indices = @transform_3, window_bounds = array<i64: 2, 128, 128>}, {pipeline_mode = #tpu.pipeline_mode<synchronous>, transform_indices = @transform_4, window_bounds = array<i64: 2, 1, 128>}, {pipeline_mode = #tpu.pipeline_mode<synchronous>, transform_indices = @transform_5, window_bounds = array<i64: 128, 128>}, {pipeline_mode = #tpu.pipeline_mode<synchronous>, transform_indices = @transform_6, window_bounds = array<i64: 1, 128>}, {transform_indices = @transform_7, window_bounds = array<i64: 16, 128>}]} {
    %c0 = arith.constant 0 : index
    %c0_0 = arith.constant 0 : index
    %0 = vector.load %arg1[%c0, %c0_0] : memref<16x16xf32, #tpu.memory_space<vmem>>, vector<16x16xf32>
    %1 = arith.truncf %0 : vector<16x16xf32> to vector<16x16xbf16>
    %c0_1 = arith.constant 0 : index
    %c0_2 = arith.constant 0 : index
    %2 = vector.load %arg2[%c0_1, %c0_2] : memref<16x128xbf16, #tpu.memory_space<vmem>>, vector<16x128xbf16>
    %cst = arith.constant dense<0.000000e+00> : vector<16x128xf32>
    %3 = tpu.matmul %1, %2, %cst {dimension_numbers = #tpu.dot_dimension_numbers<[1], [0], [0], [1], [0, 0, 1, 1], [], []>} : vector<16x16xbf16>, vector<16x128xbf16>, vector<16x128xf32> -> vector<16x128xf32>
    %c0_3 = arith.constant 0 : index
    %c0_4 = arith.constant 0 : index
    %4 = vector.load %arg3[%c0_3, %c0_4] : memref<1x128xf32, #tpu.memory_space<vmem>>, vector<1x128xf32>
    %5 = vector.broadcast %4 : vector<1x128xf32> to vector<16x128xf32>
    %6 = arith.addf %3, %5 : vector<16x128xf32>
    %cst_5 = arith.constant 0.000000e+00 : f32
    %7 = vector.broadcast %cst_5 : f32 to vector<16x128xf32>
    %8 = arith.maximumf %6, %7 : vector<16x128xf32>
    %9 = arith.truncf %8 : vector<16x128xf32> to vector<16x128xbf16>
    %c0_6 = arith.constant 0 : index
    %c0_7 = arith.constant 0 : index
    %c0_8 = arith.constant 0 : index
    %10 = vector.load %arg4[%c0_6, %c0_7, %c0_8] : memref<2x128x128xbf16, #tpu.memory_space<vmem>>, vector<1x128x128xbf16>
    %11 = vector.shape_cast %10 : vector<1x128x128xbf16> to vector<128x128xbf16>
    %cst_9 = arith.constant dense<0.000000e+00> : vector<16x128xf32>
    %12 = tpu.matmul %9, %11, %cst_9 {dimension_numbers = #tpu.dot_dimension_numbers<[1], [0], [0], [1], [0, 0, 1, 1], [], []>} : vector<16x128xbf16>, vector<128x128xbf16>, vector<16x128xf32> -> vector<16x128xf32>
    %c0_10 = arith.constant 0 : index
    %c0_11 = arith.constant 0 : index
    %c0_12 = arith.constant 0 : index
    %13 = vector.load %arg5[%c0_10, %c0_11, %c0_12] : memref<2x1x128xf32, #tpu.memory_space<vmem>>, vector<1x1x128xf32>
    %14 = vector.shape_cast %13 : vector<1x1x128xf32> to vector<1x128xf32>
    %15 = vector.broadcast %14 : vector<1x128xf32> to vector<16x128xf32>
    %16 = arith.addf %12, %15 : vector<16x128xf32>
    %cst_13 = arith.constant 0.000000e+00 : f32
    %17 = vector.broadcast %cst_13 : f32 to vector<16x128xf32>
    %18 = arith.maximumf %16, %17 : vector<16x128xf32>
    %19 = arith.truncf %18 : vector<16x128xf32> to vector<16x128xbf16>
    %c1 = arith.constant 1 : index
    %c0_14 = arith.constant 0 : index
    %c0_15 = arith.constant 0 : index
    %20 = vector.load %arg4[%c1, %c0_14, %c0_15] : memref<2x128x128xbf16, #tpu.memory_space<vmem>>, vector<1x128x128xbf16>
    %21 = vector.shape_cast %20 : vector<1x128x128xbf16> to vector<128x128xbf16>
    %cst_16 = arith.constant dense<0.000000e+00> : vector<16x128xf32>
    %22 = tpu.matmul %19, %21, %cst_16 {dimension_numbers = #tpu.dot_dimension_numbers<[1], [0], [0], [1], [0, 0, 1, 1], [], []>} : vector<16x128xbf16>, vector<128x128xbf16>, vector<16x128xf32> -> vector<16x128xf32>
    %c1_17 = arith.constant 1 : index
    %c0_18 = arith.constant 0 : index
    %c0_19 = arith.constant 0 : index
    %23 = vector.load %arg5[%c1_17, %c0_18, %c0_19] : memref<2x1x128xf32, #tpu.memory_space<vmem>>, vector<1x1x128xf32>
    %24 = vector.shape_cast %23 : vector<1x1x128xf32> to vector<1x128xf32>
    %25 = vector.broadcast %24 : vector<1x128xf32> to vector<16x128xf32>
    %26 = arith.addf %22, %25 : vector<16x128xf32>
    %cst_20 = arith.constant 0.000000e+00 : f32
    %27 = vector.broadcast %cst_20 : f32 to vector<16x128xf32>
    %28 = arith.maximumf %26, %27 : vector<16x128xf32>
    %29 = arith.truncf %28 : vector<16x128xf32> to vector<16x128xbf16>
    %c0_21 = arith.constant 0 : index
    %c0_22 = arith.constant 0 : index
    %30 = vector.load %arg6[%c0_21, %c0_22] : memref<128x128xbf16, #tpu.memory_space<vmem>>, vector<128x128xbf16>
    %cst_23 = arith.constant dense<0.000000e+00> : vector<16x128xf32>
    %31 = tpu.matmul %29, %30, %cst_23 {dimension_numbers = #tpu.dot_dimension_numbers<[1], [0], [0], [1], [0, 0, 1, 1], [], []>} : vector<16x128xbf16>, vector<128x128xbf16>, vector<16x128xf32> -> vector<16x128xf32>
    %c0_24 = arith.constant 0 : index
    %c0_25 = arith.constant 0 : index
    %32 = vector.load %arg7[%c0_24, %c0_25] : memref<1x128xf32, #tpu.memory_space<vmem>>, vector<1x128xf32>
    %33 = vector.broadcast %32 : vector<1x128xf32> to vector<16x128xf32>
    %34 = arith.addf %31, %33 : vector<16x128xf32>
    %c0_26 = arith.constant 0 : index
    %c0_27 = arith.constant 0 : index
    %35 = vector.load %arg8[%c0_26, %c0_27] : memref<16x128xf32, #tpu.memory_space<vmem>>, vector<16x128xf32>
    tpu.vector_store %arg8[%c0_26, %c0_27], %34 {strides = array<i32>} : memref<16x128xf32, #tpu.memory_space<vmem>>, vector<16x128xf32>,
    return
  }
  func.func @transform_0(%arg0: i32) -> (i32, i32) {
    %c0_i32 = arith.constant 0 : i32
    %c0_i32_0 = arith.constant 0 : i32
    return %arg0, %c0_i32 : i32, i32
  }
  func.func @transform_1(%arg0: i32) -> (i32, i32) {
    %c0_i32 = arith.constant 0 : i32
    %c0_i32_0 = arith.constant 0 : i32
    %c0_i32_1 = arith.constant 0 : i32
    return %c0_i32, %c0_i32_0 : i32, i32
  }
  func.func @transform_2(%arg0: i32) -> (i32, i32) {
    %c0_i32 = arith.constant 0 : i32
    %c0_i32_0 = arith.constant 0 : i32
    %c0_i32_1 = arith.constant 0 : i32
    return %c0_i32, %c0_i32_0 : i32, i32
  }
  func.func @transform_3(%arg0: i32) -> (i32, i32, i32) {
    %c0_i32 = arith.constant 0 : i32
    %c0_i32_0 = arith.constant 0 : i32
    %c0_i32_1 = arith.constant 0 : i32
    %c0_i32_2 = arith.constant 0 : i32
    return %c0_i32, %c0_i32_0, %c0_i32_1 : i32, i32, i32
  }
  func.func @transform_4(%arg0: i32) -> (i32, i32, i32) {
    %c0_i32 = arith.constant 0 : i32
    %c0_i32_0 = arith.constant 0 : i32
    %c0_i32_1 = arith.constant 0 : i32
    %c0_i32_2 = arith.constant 0 : i32
    return %c0_i32, %c0_i32_0, %c0_i32_1 : i32, i32, i32
  }
  func.func @transform_5(%arg0: i32) -> (i32, i32) {
    %c0_i32 = arith.constant 0 : i32
    %c0_i32_0 = arith.constant 0 : i32
    %c0_i32_1 = arith.constant 0 : i32
    return %c0_i32, %c0_i32_0 : i32, i32
  }
  func.func @transform_6(%arg0: i32) -> (i32, i32) {
    %c0_i32 = arith.constant 0 : i32
    %c0_i32_0 = arith.constant 0 : i32
    %c0_i32_1 = arith.constant 0 : i32
    return %c0_i32, %c0_i32_0 : i32, i32
  }
  func.func @transform_7(%arg0: i32) -> (i32, i32) {
    %c0_i32 = arith.constant 0 : i32
    %c0_i32_0 = arith.constant 0 : i32
    return %arg0, %c0_i32 : i32, i32
  }
}

</mosaic_0001>

<bundles_post_ra>
// kernel: tpu_custom_call.1
= control target key start
LH: loop header
LB: loop body
LE: loop exit
PB: predicated region body
PF: predicated region fallthrough
CT: control target
= control target key end

     0   :  { %12 = vsyncpa [#allocation3], 0  ;;  %s972_s0 = inlined_call_operand.hbm [shape: f32[16,16], index: 0, kind: input, shape index: {}]   ;;  %s973_s1 = inlined_call_operand.hbm [shape: bf16[16,128], index: 1, kind: input, shape index: {}]   ;;  %s974_s2 = inlined_call_operand.vmem [shape: f32[1,128], index: 2, kind: input, shape index: {}]   ;;  %s975_s3 = inlined_call_operand.hbm [shape: bf16[2,128,128], index: 3, kind: input, shape index: {}]   ;;  %s976_s4 = inlined_call_operand.vmem [shape: f32[2,1,128], index: 4, kind: input, shape index: {}]   ;;  %s977_s5 = inlined_call_operand.hbm [shape: bf16[128,128], index: 5, kind: input, shape index: {}]   ;;  %s978_s6 = inlined_call_operand.vmem [shape: f32[1,128], index: 6, kind: input, shape index: {}]   ;;  %s979_s7 = inlined_call_operand.hbm [shape: f32[16,128], index: 7, kind: output, shape index: {}]  }
   0x1   :  { %13 = vsyncpa [#allocation6], 0 }
   0x2   :  { %14 = vsyncpa [#allocation9], 0 }
   0x3   :  { %15 = vsyncpa [#allocation4], 0  ;;  %s794_s24 = smov [#allocation5]   ;;  %s676_s28 = scalar_lea.hbm %s973_s1, 128 }
   0x4   :  { %s33_s25 = sshll.u32 %s794_s24, 4  ;;  %p677_p0 = scmp.ne.s32.totalorder %s973_s1, %s676_s28  ;;  %s34_s25 = int_to_ptr.vmem [resolvable:$true] %s33_s25 }
   0x5   :  { %p680_p1 = scmp.lt.u32.totalorder %s676_s28, %s973_s1 }
   0x7   :  { %p682_p2 = pnand %p680_p1, %p677_p0 }
   0x9   :  { %685 = shalt.err (!%p682_p2)
}
   0xa   :  { %s686_s10 = scalar_lea.vmem %s34_s25, 128  ;;  %p691_p4 = scmp.lt.s32.totalorder %s34_s25, %s34_s25 }
   0xb   :  { %p687_p3 = scmp.ne.s32.totalorder %s34_s25, %s686_s10  ;;  %p692_p5 = scmp.lt.s32.totalorder %s686_s10, %s686_s10 }
   0xd   :  { %p693_p6 = por %p692_p5, %p691_p4 }
   0xf   :  { %p694_p7 = pnand %p693_p6, %p687_p3 }
  0x11   :  { %697 = shalt.err (!%p694_p7)
}
  0x12   :  { %s795_s11 = smov 64   ;;  %s796_s12 = smov 4  }
  0x13   :  { %39 = dma.hbm_to_vmem [thread:$0]  %s973_s1, 128, %s34_s25, [#allocation6], %s795_s11, %s795_s11, %s796_s12  }
  0x14   :  { %s797_s15 = smov [#allocation2]   ;;  %s698_s19 = scalar_lea.hbm %s972_s0, 256 }
  0x15   :  { %s21_s16 = sshll.u32 %s797_s15, 4  ;;  %p699_p8 = scmp.ne.s32.totalorder %s972_s0, %s698_s19  ;;  %s22_s16 = int_to_ptr.vmem [resolvable:$true] %s21_s16 }
  0x16   :  { %p702_p9 = scmp.lt.u32.totalorder %s698_s19, %s972_s0 }
  0x18   :  { %p704_p10 = pnand %p702_p9, %p699_p8 }
  0x1a   :  { %707 = shalt.err (!%p704_p10)
}
  0x1b   :  { %s708_s24 = scalar_lea.vmem %s22_s16, 256  ;;  %p713_p12 = scmp.lt.s32.totalorder %s22_s16, %s22_s16 }
  0x1c   :  { %p709_p11 = scmp.ne.s32.totalorder %s22_s16, %s708_s24  ;;  %p714_p13 = scmp.lt.s32.totalorder %s708_s24, %s708_s24 }
  0x1e   :  { %p715_p0 = por %p714_p13, %p713_p12 }
  0x20   :  { %p716_p1 = pnand %p715_p0, %p709_p11 }
  0x22   :  { %719 = shalt.err (!%p716_p1)
}
  0x23   :  { %s798_s1 = smov 128   ;;  %s799_s25 = smov 8  }
  0x24   :  { %27 = dma.hbm_to_vmem [thread:$0]  %s972_s0, 256, %s22_s16, [#allocation3], %s798_s1, %s798_s1, %s799_s25  }
  0x25   :  { %s800_s28 = smov [#allocation7]   ;;  %s801_s30 = smov [#allocation8]  }
  0x26   :  { %s47_s29 = sshll.u32 %s800_s28, 4  ;;  %s61_s8 = sshll.u32 %s801_s30, 4  ;;  %s48_s29 = int_to_ptr.vmem [resolvable:$true] %s47_s29  ;;  %s875_s8 = int_to_ptr.vmem [resolvable:$true] %s61_s8 }
  0x27   :  { %s720_s13 = scalar_lea.hbm %s975_s3, 2048 }
  0x28   :  { %p721_p2 = scmp.ne.s32.totalorder %s975_s3, %s720_s13  ;;  %p724_p3 = scmp.lt.u32.totalorder %s720_s13, %s975_s3 }
  0x2a   :  { %p726_p4 = pnand %p724_p3, %p721_p2 }
  0x2c   :  { %729 = shalt.err (!%p726_p4)
}
  0x2d   :  { %s730_s0 = scalar_lea.vmem %s48_s29, 2048  ;;  %p735_p6 = scmp.lt.s32.totalorder %s48_s29, %s48_s29 }
  0x2e   :  { %p731_p5 = scmp.ne.s32.totalorder %s48_s29, %s730_s0  ;;  %p736_p7 = scmp.lt.s32.totalorder %s730_s0, %s730_s0 }
  0x30   :  { %p737_p8 = por %p736_p7, %p735_p6 }
  0x32   :  { %p738_p9 = pnand %p737_p8, %p731_p5 }
  0x34   :  { %741 = shalt.err (!%p738_p9)
}
  0x35   :  { %53 = dma.hbm_to_vmem [thread:$0]  %s975_s3, 2048, %s48_s29, [#allocation6], %s795_s11, %s795_s11, %s796_s12  }
  0x36   :  { %s742_s22 = scalar_lea.hbm %s977_s5, 1024 }
  0x37   :  { %p743_p10 = scmp.ne.s32.totalorder %s977_s5, %s742_s22  ;;  %p746_p11 = scmp.lt.u32.totalorder %s742_s22, %s977_s5 }
  0x39   :  { %p748_p12 = pnand %p746_p11, %p743_p10 }
  0x3b   :  { %751 = shalt.err (!%p748_p12)
}
  0x3c   :  { %s752_s28 = scalar_lea.vmem %s875_s8, 1024  ;;  %p757_p0 = scmp.lt.s32.totalorder %s875_s8, %s875_s8 }
  0x3d   :  { %p753_p13 = scmp.ne.s32.totalorder %s875_s8, %s752_s28  ;;  %p758_p1 = scmp.lt.s32.totalorder %s752_s28, %s752_s28 }
  0x3f   :  { %p759_p2 = por %p758_p1, %p757_p0 }
  0x41   :  { %p760_p3 = pnand %p759_p2, %p753_p13 }
  0x43   :  { %763 = shalt.err (!%p760_p3)
}
  0x44   :  { %67 = dma.hbm_to_vmem [thread:$0]  %s977_s5, 1024, %s875_s8, [#allocation9], %s795_s11, %s795_s11, %s796_s12  }
  0x45   :  { %786 = dma.done.wait [#allocation3], 256  }
  0x46   :  { %787 = vsyncadd [#allocation3], 4294967040 }
  0x47   :  { %788 = dma.done.wait [#allocation6], 2176  }
  0x48   :  { %789 = vsyncadd [#allocation6], 4294965120 }
  0x49   :  { %790 = dma.done.wait [#allocation9], 1024  }
  0x4a   :  { %791 = vsyncadd [#allocation9], 4294966272  ;;  %v802_v0 = vmov 0.0   ;;  %vm803_vm0 = vmmov 0   ;;  %v651_v1 = vld [vmem:[#allocation5] sm:$0xff]   ;;  %v83_v2 = vld [vmem:[#allocation2] sm:$0xff] }
  0x4b   :  { %574 = vmatprep.subr.bf16.mxu0 %v802_v0  ;;  %576 = vmatprep.mubr.msk.bf16.mxu0 %vm803_vm0, %v802_v0  ;;  %v84_v3 = vld [vmem:[#allocation2 + $0x8] sm:$0xff]  ;;  %vm101_vm1 = vcmask 130048   ;;  %v652_v5 = vld [vmem:[#allocation7] sm:$0xff]   ;;  %v653_v6 = vld [vmem:[#allocation7 + $0x8] sm:$0xff]   ;;  %s804_s13 = smov [#allocation10]  }
  0x4c   :  { %580 = vmatprep.subr.bf16.mxu1 %v802_v0  ;;  %596 = vmatprep.mubr.msk.bf16.mxu1 %vm803_vm0, %v802_v0  ;;  %v85_v4 = vpack.c.bf16 %v84_v3, %v83_v2  ;;  %v654_v7 = vld [vmem:[#allocation7 + $0x10] sm:$0xff]   ;;  %v655_v8 = vld [vmem:[#allocation7 + $0x18] sm:$0xff]   ;;  %v656_v9 = vld [vmem:[#allocation7 + $0x20] sm:$0xff]   ;;  %s500_s14 = sshll.u32 %s804_s13, 4  ;;  %s501_s14 = int_to_ptr.vmem [resolvable:$true] %s500_s14 }
  0x4d   :  { %575 = vmatpush3.bf16.msra.mxu0 %v651_v1  ;;  %581 = vmatpush3.bf16.msra.mxu1 %v652_v5  ;;  %v657_v10 = vld [vmem:[#allocation7 + $0x28] sm:$0xff]   ;;  %v658_v11 = vld [vmem:[#allocation7 + $0x30] sm:$0xff]   ;;  %v659_v12 = vld [vmem:[#allocation7 + $0x38] sm:$0xff]   ;;  %p769_p5 = scmp.lt.s32.totalorder %s501_s14, %s501_s14 }
  0x4e   :  { %600 = vmatprep.subr.bf16.mxu0 %v802_v0  ;;  %582 = vmatprep.subr.bf16.mxu1 %v802_v0  ;;  %v660_v13 = vld [vmem:[#allocation7 + $0x40] sm:$0xff]   ;;  %v661_v14 = vld [vmem:[#allocation7 + $0x48] sm:$0xff]   ;;  %v662_v15 = vld [vmem:[#allocation7 + $0x50] sm:$0xff]  }
  0x4f   :  { %v663_v16 = vld [vmem:[#allocation7 + $0x58] sm:$0xff]   ;;  %v664_v17 = vld [vmem:[#allocation7 + $0x60] sm:$0xff]   ;;  %v665_v18 = vld [vmem:[#allocation7 + $0x68] sm:$0xff]  }
  0x50   :  { %577 = vmatmul.mubr.msk.bf16.vlgmr.msra.gmra.mrb[0].mxu0 %vm101_vm1, %v85_v4  ;;  %v514_v19 = vld [vmem:[%s974_s2] ss:$0 sm:$0xff]  ;;  %v666_v29 = vld [vmem:[#allocation7 + $0x70] sm:$0xff]   ;;  %v667_v30 = vld [vmem:[#allocation7 + $0x78] sm:$0xff]  }
  0x51   :  { %616 = vmatprep.mubr.msk.bf16.mxu0 %vm803_vm0, %v802_v0  ;;  %583 = vmatpush3.bf16.msra.mxu1 %v653_v6  ;;  %v668_v31 = vld [vmem:[#allocation8] sm:$0xff]   ;;  %v669_v32 = vld [vmem:[#allocation8 + $0x8] sm:$0xff]   ;;  %v670_v33 = vld [vmem:[#allocation8 + $0x10] sm:$0xff]  }
  0x52   :  { %584 = vmatprep.subr.bf16.mxu1 %v802_v0  ;;  %601 = vmatpush3.bf16.msra.mxu0 %v660_v13  ;;  %v671_v34 = vld [vmem:[#allocation8 + $0x18] sm:$0xff]   ;;  %v672_v35 = vld [vmem:[#allocation8 + $0x20] sm:$0xff]   ;;  %v673_v36 = vld [vmem:[#allocation8 + $0x28] sm:$0xff]  }
  0x53   :  { %602 = vmatprep.subr.bf16.mxu0 %v802_v0  ;;  %v517_v37 = vld [vmem:[%s976_s4] ss:$0 sm:$0xff]  ;;  %v674_v47 = vld [vmem:[#allocation8 + $0x30] sm:$0xff]   ;;  %v675_v48 = vld [vmem:[#allocation8 + $0x38] sm:$0xff]  }
  0x54   :  { %v527_v49 = vld [vmem:[%s976_s4 + $0x1] ss:$0 sm:$0xff]  ;;  %v536_v59 = vld [vmem:[%s978_s6] ss:$0 sm:$0xff]  ;;  %s764_s4 = scalar_lea.vmem %s501_s14, 256 }
  0x55   :  { %585 = vmatpush3.bf16.msra.mxu1 %v654_v7  ;;  %p765_p4 = scmp.ne.s32.totalorder %s501_s14, %s764_s4  ;;  %p770_p6 = scmp.lt.s32.totalorder %s764_s4, %s764_s4 }
  0x56   :  { %586 = vmatprep.subr.bf16.mxu1 %v802_v0  ;;  %603 = vmatpush3.bf16.msra.mxu0 %v661_v14 }
  0x57   :  { %604 = vmatprep.subr.bf16.mxu0 %v802_v0  ;;  %p771_p7 = por %p770_p6, %p769_p5 }
  0x59   :  { %587 = vmatpush3.bf16.msra.mxu1 %v655_v8  ;;  %p772_p8 = pnand %p771_p7, %p765_p4 }
  0x5a   :  { %588 = vmatprep.subr.bf16.mxu1 %v802_v0  ;;  %605 = vmatpush3.bf16.msra.mxu0 %v662_v15 }
  0x5b   :  { %606 = vmatprep.subr.bf16.mxu0 %v802_v0 }
  0x5d   :  { %589 = vmatpush3.bf16.msra.mxu1 %v656_v9 }
  0x5e   :  { %590 = vmatprep.subr.bf16.mxu1 %v802_v0  ;;  %607 = vmatpush3.bf16.msra.mxu0 %v663_v16 }
  0x5f   :  { %608 = vmatprep.subr.bf16.mxu0 %v802_v0 }
  0x61   :  { %591 = vmatpush3.bf16.msra.mxu1 %v657_v10 }
  0x62   :  { %592 = vmatprep.subr.bf16.mxu1 %v802_v0  ;;  %609 = vmatpush3.bf16.msra.mxu0 %v664_v17 }
  0x63   :  { %610 = vmatprep.subr.bf16.mxu0 %v802_v0 }
  0x65   :  { %593 = vmatpush3.bf16.msra.mxu1 %v658_v11 }
  0x66   :  { %594 = vmatprep.subr.bf16.mxu1 %v802_v0  ;;  %611 = vmatpush3.bf16.msra.mxu0 %v665_v18 }
  0x67   :  { %612 = vmatprep.subr.bf16.mxu0 %v802_v0 }
  0x69   :  { %595 = vmatpush3.bf16.msra.mxu1 %v659_v12 }
  0x6a   :  { %620 = vmatprep.subr.bf16.mxu1 %v802_v0  ;;  %613 = vmatpush3.bf16.msra.mxu0 %v666_v29 }
  0x6b   :  { %614 = vmatprep.subr.bf16.mxu0 %v802_v0 }
  0x6e   :  { %615 = vmatpush3.bf16.msra.mxu0 %v667_v30 }
 0x123   :  { %v139_v20 = vpop.f32.mrb[0].mxu0 }
 0x124   :  { %v140_v21 = vadd.f32 %v514_v19, %v139_v20  ;;  %v578_v22 = vpop.f32.mrb[1].mxu0 }
 0x125   :  { %v142_v23 = vpop.f32.mrb[2].mxu0 }
 0x126   :  { %v143_v24 = vadd.f32 %v514_v19, %v142_v23  ;;  %v579_v25 = vpop.f32.mrb[3].mxu0  ;;  %v146_v26 = vmax.f32 %v140_v21, 0.0 }
 0x128   :  { %v147_v27 = vmax.f32 %v143_v24, 0.0 }
 0x12a   :  { %v148_v28 = vpack.c.bf16 %v147_v27, %v146_v26 }
 0x12c   :  { %597 = vmatmul.mubr.bf16.vlgmr.msra.gmra.mrb[0].mxu1 %v148_v28 }
 0x12d   :  { %636 = vmatprep.mubr.msk.bf16.mxu1 %vm803_vm0, %v802_v0  ;;  %621 = vmatpush3.bf16.msra.mxu1 %v668_v31 }
 0x12e   :  { %622 = vmatprep.subr.bf16.mxu1 %v802_v0 }
 0x131   :  { %623 = vmatpush3.bf16.msra.mxu1 %v669_v32 }
 0x132   :  { %624 = vmatprep.subr.bf16.mxu1 %v802_v0 }
 0x135   :  { %625 = vmatpush3.bf16.msra.mxu1 %v670_v33 }
 0x136   :  { %626 = vmatprep.subr.bf16.mxu1 %v802_v0 }
 0x139   :  { %627 = vmatpush3.bf16.msra.mxu1 %v671_v34 }
 0x13a   :  { %628 = vmatprep.subr.bf16.mxu1 %v802_v0 }
 0x13d   :  { %629 = vmatpush3.bf16.msra.mxu1 %v672_v35 }
 0x13e   :  { %630 = vmatprep.subr.bf16.mxu1 %v802_v0 }
 0x141   :  { %631 = vmatpush3.bf16.msra.mxu1 %v673_v36 }
 0x142   :  { %632 = vmatprep.subr.bf16.mxu1 %v802_v0 }
 0x145   :  { %633 = vmatpush3.bf16.msra.mxu1 %v674_v47 }
 0x146   :  { %634 = vmatprep.subr.bf16.mxu1 %v802_v0 }
 0x149   :  { %635 = vmatpush3.bf16.msra.mxu1 %v675_v48 }
 0x1ff   :  { %v254_v38 = vpop.f32.mrb[0].mxu1 }
 0x200   :  { %v255_v39 = vadd.f32 %v517_v37, %v254_v38  ;;  %v598_v40 = vpop.f32.mrb[1].mxu1 }
 0x201   :  { %v257_v41 = vpop.f32.mrb[2].mxu1 }
 0x202   :  { %v258_v42 = vadd.f32 %v517_v37, %v257_v41  ;;  %v599_v43 = vpop.f32.mrb[3].mxu1  ;;  %v261_v44 = vmax.f32 %v255_v39, 0.0 }
 0x204   :  { %v262_v45 = vmax.f32 %v258_v42, 0.0 }
 0x206   :  { %v263_v46 = vpack.c.bf16 %v262_v45, %v261_v44 }
 0x208   :  { %617 = vmatmul.mubr.bf16.vlgmr.msra.gmra.mrb[4].mxu0 %v263_v46 }
 0x2db   :  { %v371_v50 = vpop.f32.mrb[4].mxu0 }
 0x2dc   :  { %v372_v51 = vadd.f32 %v527_v49, %v371_v50  ;;  %v618_v52 = vpop.f32.mrb[5].mxu0 }
 0x2dd   :  { %v374_v53 = vpop.f32.mrb[6].mxu0 }
 0x2de   :  { %v375_v54 = vadd.f32 %v527_v49, %v374_v53  ;;  %v619_v55 = vpop.f32.mrb[7].mxu0  ;;  %v378_v56 = vmax.f32 %v372_v51, 0.0 }
 0x2e0   :  { %v379_v57 = vmax.f32 %v375_v54, 0.0 }
 0x2e2   :  { %v380_v58 = vpack.c.bf16 %v379_v57, %v378_v56 }
 0x2e4   :  { %637 = vmatmul.mubr.bf16.vlgmr.msra.gmra.mrb[4].mxu1 %v380_v58 }
 0x3b7   :  { %v486_v60 = vpop.f32.mrb[4].mxu1 }
 0x3b8   :  { %v487_v61 = vadd.f32 %v536_v59, %v486_v60  ;;  %v638_v62 = vpop.f32.mrb[5].mxu1 }
 0x3b9   :  { %v489_v63 = vpop.f32.mrb[6].mxu1 }
 0x3ba   :  { %493 = vst [vmem:[#allocation10] sm:$0xff] %v487_v61  ;;  %v490_v0 = vadd.f32 %v536_v59, %v489_v63  ;;  %v639_v1 = vpop.f32.mrb[7].mxu1 }
 0x3bc   :  { %494 = vst [vmem:[#allocation10 + $0x8] sm:$0xff] %v490_v0 }
 0x3bd   :  { %775 = shalt.err (!%p772_p8)
}
 0x3be   :  { %s776_s17 = scalar_lea.hbm %s979_s7, 256 }
 0x3bf   :  { %p777_p9 = scmp.ne.s32.totalorder %s979_s7, %s776_s17  ;;  %p780_p10 = scmp.lt.u32.totalorder %s776_s17, %s979_s7 }
 0x3c1   :  { %p782_p11 = pnand %p780_p10, %p777_p9 }
 0x3c3   :  { %785 = shalt.err (!%p782_p11)
}
 0x3c4   :  { %506 = dma.vmem_to_hbm [thread:$0]  %s501_s14, 256, %s979_s7, [#allocation4], %s798_s1, %s798_s1, %s799_s25  }
 0x3c5   :  { %792 = dma.done.wait [#allocation4], 256  }
 0x3c6   :  { %793 = vsyncadd [#allocation4], 4294967040 }
 0x3c7   :  { %510 = vsyncpa [#allocation3], 1 }
 0x3c8   :  { %511 = vsyncpa [#allocation6], 1 }
 0x3c9   :  { %512 = vsyncpa [#allocation9], 1 }
 0x3ca   :  { %513 = vsyncpa [#allocation4], 1 }

// kernel: tpu_custom_call.1
= control target key start
LH: loop header
LB: loop body
LE: loop exit
PB: predicated region body
PF: predicated region fallthrough
CT: control target
= control target key end

     0   :  { %12 = vsyncpa [#allocation3], 0  ;;  %s972_s0 = inlined_call_operand.hbm [shape: f32[16,16], index: 0, kind: input, shape index: {}]   ;;  %s973_s1 = inlined_call_operand.hbm [shape: bf16[16,128], index: 1, kind: input, shape index: {}]   ;;  %s974_s2 = inlined_call_operand.vmem [shape: f32[1,128], index: 2, kind: input, shape index: {}]   ;;  %s975_s3 = inlined_call_operand.hbm [shape: bf16[2,128,128], index: 3, kind: input, shape index: {}]   ;;  %s976_s4 = inlined_call_operand.vmem [shape: f32[2,1,128], index: 4, kind: input, shape index: {}]   ;;  %s977_s5 = inlined_call_operand.hbm [shape: bf16[128,128], index: 5, kind: input, shape index: {}]   ;;  %s978_s6 = inlined_call_operand.vmem [shape: f32[1,128], index: 6, kind: input, shape index: {}]   ;;  %s979_s7 = inlined_call_operand.hbm [shape: f32[16,128], index: 7, kind: output, shape index: {}]  }
   0x1   :  { %13 = vsyncpa [#allocation6], 0 }
   0x2   :  { %14 = vsyncpa [#allocation9], 0 }
   0x3   :  { %15 = vsyncpa [#allocation4], 0  ;;  %s794_s24 = smov [#allocation5]   ;;  %s676_s28 = scalar_lea.hbm %s973_s1, 128 }
   0x4   :  { %s33_s25 = sshll.u32 %s794_s24, 4  ;;  %p677_p0 = scmp.ne.s32.totalorder %s973_s1, %s676_s28  ;;  %s34_s25 = int_to_ptr.vmem [resolvable:$true] %s33_s25 }
   0x5   :  { %p680_p1 = scmp.lt.u32.totalorder %s676_s28, %s973_s1 }
   0x7   :  { %p682_p2 = pnand %p680_p1, %p677_p0 }
   0x9   :  { %685 = shalt.err (!%p682_p2)
}
   0xa   :  { %s686_s10 = scalar_lea.vmem %s34_s25, 128  ;;  %p691_p4 = scmp.lt.s32.totalorder %s34_s25, %s34_s25 }
   0xb   :  { %p687_p3 = scmp.ne.s32.totalorder %s34_s25, %s686_s10  ;;  %p692_p5 = scmp.lt.s32.totalorder %s686_s10, %s686_s10 }
   0xd   :  { %p693_p6 = por %p692_p5, %p691_p4 }
   0xf   :  { %p694_p7 = pnand %p693_p6, %p687_p3 }
  0x11   :  { %697 = shalt.err (!%p694_p7)
}
  0x12   :  { %s795_s11 = smov 64   ;;  %s796_s12 = smov 4  }
  0x13   :  { %39 = dma.hbm_to_vmem [thread:$0]  %s973_s1, 128, %s34_s25, [#allocation6], %s795_s11, %s795_s11, %s796_s12  }
  0x14   :  { %s797_s15 = smov [#allocation2]   ;;  %s698_s19 = scalar_lea.hbm %s972_s0, 256 }
  0x15   :  { %s21_s16 = sshll.u32 %s797_s15, 4  ;;  %p699_p8 = scmp.ne.s32.totalorder %s972_s0, %s698_s19  ;;  %s22_s16 = int_to_ptr.vmem [resolvable:$true] %s21_s16 }
  0x16   :  { %p702_p9 = scmp.lt.u32.totalorder %s698_s19, %s972_s0 }
  0x18   :  { %p704_p10 = pnand %p702_p9, %p699_p8 }
  0x1a   :  { %707 = shalt.err (!%p704_p10)
}
  0x1b   :  { %s708_s24 = scalar_lea.vmem %s22_s16, 256  ;;  %p713_p12 = scmp.lt.s32.totalorder %s22_s16, %s22_s16 }
  0x1c   :  { %p709_p11 = scmp.ne.s32.totalorder %s22_s16, %s708_s24  ;;  %p714_p13 = scmp.lt.s32.totalorder %s708_s24, %s708_s24 }
  0x1e   :  { %p715_p0 = por %p714_p13, %p713_p12 }
  0x20   :  { %p716_p1 = pnand %p715_p0, %p709_p11 }
  0x22   :  { %719 = shalt.err (!%p716_p1)
}
  0x23   :  { %s798_s1 = smov 128   ;;  %s799_s25 = smov 8  }
  0x24   :  { %27 = dma.hbm_to_vmem [thread:$0]  %s972_s0, 256, %s22_s16, [#allocation3], %s798_s1, %s798_s1, %s799_s25  }
  0x25   :  { %s800_s28 = smov [#allocation7]   ;;  %s801_s30 = smov [#allocation8]  }
  0x26   :  { %s47_s29 = sshll.u32 %s800_s28, 4  ;;  %s61_s8 = sshll.u32 %s801_s30, 4  ;;  %s48_s29 = int_to_ptr.vmem [resolvable:$true] %s47_s29  ;;  %s875_s8 = int_to_ptr.vmem [resolvable:$true] %s61_s8 }
  0x27   :  { %s720_s13 = scalar_lea.hbm %s975_s3, 2048 }
  0x28   :  { %p721_p2 = scmp.ne.s32.totalorder %s975_s3, %s720_s13  ;;  %p724_p3 = scmp.lt.u32.totalorder %s720_s13, %s975_s3 }
  0x2a   :  { %p726_p4 = pnand %p724_p3, %p721_p2 }
  0x2c   :  { %729 = shalt.err (!%p726_p4)
}
  0x2d   :  { %s730_s0 = scalar_lea.vmem %s48_s29, 2048  ;;  %p735_p6 = scmp.lt.s32.totalorder %s48_s29, %s48_s29 }
  0x2e   :  { %p731_p5 = scmp.ne.s32.totalorder %s48_s29, %s730_s0  ;;  %p736_p7 = scmp.lt.s32.totalorder %s730_s0, %s730_s0 }
  0x30   :  { %p737_p8 = por %p736_p7, %p735_p6 }
  0x32   :  { %p738_p9 = pnand %p737_p8, %p731_p5 }
  0x34   :  { %741 = shalt.err (!%p738_p9)
}
  0x35   :  { %53 = dma.hbm_to_vmem [thread:$0]  %s975_s3, 2048, %s48_s29, [#allocation6], %s795_s11, %s795_s11, %s796_s12  }
  0x36   :  { %s742_s22 = scalar_lea.hbm %s977_s5, 1024 }
  0x37   :  { %p743_p10 = scmp.ne.s32.totalorder %s977_s5, %s742_s22  ;;  %p746_p11 = scmp.lt.u32.totalorder %s742_s22, %s977_s5 }
  0x39   :  { %p748_p12 = pnand %p746_p11, %p743_p10 }
  0x3b   :  { %751 = shalt.err (!%p748_p12)
}
  0x3c   :  { %s752_s28 = scalar_lea.vmem %s875_s8, 1024  ;;  %p757_p0 = scmp.lt.s32.totalorder %s875_s8, %s875_s8 }
  0x3d   :  { %p753_p13 = scmp.ne.s32.totalorder %s875_s8, %s752_s28  ;;  %p758_p1 = scmp.lt.s32.totalorder %s752_s28, %s752_s28 }
  0x3f   :  { %p759_p2 = por %p758_p1, %p757_p0 }
  0x41   :  { %p760_p3 = pnand %p759_p2, %p753_p13 }
  0x43   :  { %763 = shalt.err (!%p760_p3)
}
  0x44   :  { %67 = dma.hbm_to_vmem [thread:$0]  %s977_s5, 1024, %s875_s8, [#allocation9], %s795_s11, %s795_s11, %s796_s12  }
  0x45   :  { %786 = dma.done.wait [#allocation3], 256  }
  0x46   :  { %787 = vsyncadd [#allocation3], 4294967040 }
  0x47   :  { %788 = dma.done.wait [#allocation6], 2176  }
  0x48   :  { %789 = vsyncadd [#allocation6], 4294965120 }
  0x49   :  { %790 = dma.done.wait [#allocation9], 1024  }
  0x4a   :  { %791 = vsyncadd [#allocation9], 4294966272  ;;  %v802_v0 = vmov 0.0   ;;  %vm803_vm0 = vmmov 0   ;;  %v651_v1 = vld [vmem:[#allocation5] sm:$0xff]   ;;  %v83_v2 = vld [vmem:[#allocation2] sm:$0xff] }
  0x4b   :  { %574 = vmatprep.subr.bf16.mxu0 %v802_v0  ;;  %576 = vmatprep.mubr.msk.bf16.mxu0 %vm803_vm0, %v802_v0  ;;  %v84_v3 = vld [vmem:[#allocation2 + $0x8] sm:$0xff]  ;;  %vm101_vm1 = vcmask 130048   ;;  %v652_v5 = vld [vmem:[#allocation7] sm:$0xff]   ;;  %v653_v6 = vld [vmem:[#allocation7 + $0x8] sm:$0xff]   ;;  %s804_s13 = smov [#allocation10]  }
  0x4c   :  { %580 = vmatprep.subr.bf16.mxu1 %v802_v0  ;;  %596 = vmatprep.mubr.msk.bf16.mxu1 %vm803_vm0, %v802_v0  ;;  %v85_v4 = vpack.c.bf16 %v84_v3, %v83_v2  ;;  %v654_v7 = vld [vmem:[#allocation7 + $0x10] sm:$0xff]   ;;  %v655_v8 = vld [vmem:[#allocation7 + $0x18] sm:$0xff]   ;;  %v656_v9 = vld [vmem:[#allocation7 + $0x20] sm:$0xff]   ;;  %s500_s14 = sshll.u32 %s804_s13, 4  ;;  %s501_s14 = int_to_ptr.vmem [resolvable:$true] %s500_s14 }
  0x4d   :  { %575 = vmatpush3.bf16.msra.mxu0 %v651_v1  ;;  %581 = vmatpush3.bf16.msra.mxu1 %v652_v5  ;;  %v657_v10 = vld [vmem:[#allocation7 + $0x28] sm:$0xff]   ;;  %v658_v11 = vld [vmem:[#allocation7 + $0x30] sm:$0xff]   ;;  %v659_v12 = vld [vmem:[#allocation7 + $0x38] sm:$0xff]   ;;  %p769_p5 = scmp.lt.s32.totalorder %s501_s14, %s501_s14 }
  0x4e   :  { %600 = vmatprep.subr.bf16.mxu0 %v802_v0  ;;  %582 = vmatprep.subr.bf16.mxu1 %v802_v0  ;;  %v660_v13 = vld [vmem:[#allocation7 + $0x40] sm:$0xff]   ;;  %v661_v14 = vld [vmem:[#allocation7 + $0x48] sm:$0xff]   ;;  %v662_v15 = vld [vmem:[#allocation7 + $0x50] sm:$0xff]  }
  0x4f   :  { %v663_v16 = vld [vmem:[#allocation7 + $0x58] sm:$0xff]   ;;  %v664_v17 = vld [vmem:[#allocation7 + $0x60] sm:$0xff]   ;;  %v665_v18 = vld [vmem:[#allocation7 + $0x68] sm:$0xff]  }
  0x50   :  { %577 = vmatmul.mubr.msk.bf16.vlgmr.msra.gmra.mrb[0].mxu0 %vm101_vm1, %v85_v4  ;;  %v514_v19 = vld [vmem:[%s974_s2] ss:$0 sm:$0xff]  ;;  %v666_v29 = vld [vmem:[#allocation7 + $0x70] sm:$0xff]   ;;  %v667_v30 = vld [vmem:[#allocation7 + $0x78] sm:$0xff]  }
  0x51   :  { %616 = vmatprep.mubr.msk.bf16.mxu0 %vm803_vm0, %v802_v0  ;;  %583 = vmatpush3.bf16.msra.mxu1 %v653_v6  ;;  %v668_v31 = vld [vmem:[#allocation8] sm:$0xff]   ;;  %v669_v32 = vld [vmem:[#allocation8 + $0x8] sm:$0xff]   ;;  %v670_v33 = vld [vmem:[#allocation8 + $0x10] sm:$0xff]  }
  0x52   :  { %584 = vmatprep.subr.bf16.mxu1 %v802_v0  ;;  %601 = vmatpush3.bf16.msra.mxu0 %v660_v13  ;;  %v671_v34 = vld [vmem:[#allocation8 + $0x18] sm:$0xff]   ;;  %v672_v35 = vld [vmem:[#allocation8 + $0x20] sm:$0xff]   ;;  %v673_v36 = vld [vmem:[#allocation8 + $0x28] sm:$0xff]  }
  0x53   :  { %602 = vmatprep.subr.bf16.mxu0 %v802_v0  ;;  %v517_v37 = vld [vmem:[%s976_s4] ss:$0 sm:$0xff]  ;;  %v674_v47 = vld [vmem:[#allocation8 + $0x30] sm:$0xff]   ;;  %v675_v48 = vld [vmem:[#allocation8 + $0x38] sm:$0xff]  }
  0x54   :  { %v527_v49 = vld [vmem:[%s976_s4 + $0x1] ss:$0 sm:$0xff]  ;;  %v536_v59 = vld [vmem:[%s978_s6] ss:$0 sm:$0xff]  ;;  %s764_s4 = scalar_lea.vmem %s501_s14, 256 }
  0x55   :  { %585 = vmatpush3.bf16.msra.mxu1 %v654_v7  ;;  %p765_p4 = scmp.ne.s32.totalorder %s501_s14, %s764_s4  ;;  %p770_p6 = scmp.lt.s32.totalorder %s764_s4, %s764_s4 }
  0x56   :  { %586 = vmatprep.subr.bf16.mxu1 %v802_v0  ;;  %603 = vmatpush3.bf16.msra.mxu0 %v661_v14 }
  0x57   :  { %604 = vmatprep.subr.bf16.mxu0 %v802_v0  ;;  %p771_p7 = por %p770_p6, %p769_p5 }
  0x59   :  { %587 = vmatpush3.bf16.msra.mxu1 %v655_v8  ;;  %p772_p8 = pnand %p771_p7, %p765_p4 }
  0x5a   :  { %588 = vmatprep.subr.bf16.mxu1 %v802_v0  ;;  %605 = vmatpush3.bf16.msra.mxu0 %v662_v15 }
  0x5b   :  { %606 = vmatprep.subr.bf16.mxu0 %v802_v0 }
  0x5d   :  { %589 = vmatpush3.bf16.msra.mxu1 %v656_v9 }
  0x5e   :  { %590 = vmatprep.subr.bf16.mxu1 %v802_v0  ;;  %607 = vmatpush3.bf16.msra.mxu0 %v663_v16 }
  0x5f   :  { %608 = vmatprep.subr.bf16.mxu0 %v802_v0 }
  0x61   :  { %591 = vmatpush3.bf16.msra.mxu1 %v657_v10 }
  0x62   :  { %592 = vmatprep.subr.bf16.mxu1 %v802_v0  ;;  %609 = vmatpush3.bf16.msra.mxu0 %v664_v17 }
  0x63   :  { %610 = vmatprep.subr.bf16.mxu0 %v802_v0 }
  0x65   :  { %593 = vmatpush3.bf16.msra.mxu1 %v658_v11 }
  0x66   :  { %594 = vmatprep.subr.bf16.mxu1 %v802_v0  ;;  %611 = vmatpush3.bf16.msra.mxu0 %v665_v18 }
  0x67   :  { %612 = vmatprep.subr.bf16.mxu0 %v802_v0 }
  0x69   :  { %595 = vmatpush3.bf16.msra.mxu1 %v659_v12 }
  0x6a   :  { %620 = vmatprep.subr.bf16.mxu1 %v802_v0  ;;  %613 = vmatpush3.bf16.msra.mxu0 %v666_v29 }
  0x6b   :  { %614 = vmatprep.subr.bf16.mxu0 %v802_v0 }
  0x6e   :  { %615 = vmatpush3.bf16.msra.mxu0 %v667_v30 }
 0x123   :  { %v139_v20 = vpop.f32.mrb[0].mxu0 }
 0x124   :  { %v140_v21 = vadd.f32 %v514_v19, %v139_v20  ;;  %v578_v22 = vpop.f32.mrb[1].mxu0 }
 0x125   :  { %v142_v23 = vpop.f32.mrb[2].mxu0 }
 0x126   :  { %v143_v24 = vadd.f32 %v514_v19, %v142_v23  ;;  %v579_v25 = vpop.f32.mrb[3].mxu0  ;;  %v146_v26 = vmax.f32 %v140_v21, 0.0 }
 0x128   :  { %v147_v27 = vmax.f32 %v143_v24, 0.0 }
 0x12a   :  { %v148_v28 = vpack.c.bf16 %v147_v27, %v146_v26 }
 0x12c   :  { %597 = vmatmul.mubr.bf16.vlgmr.msra.gmra.mrb[0].mxu1 %v148_v28 }
 0x12d   :  { %636 = vmatprep.mubr.msk.bf16.mxu1 %vm803_vm0, %v802_v0  ;;  %621 = vmatpush3.bf16.msra.mxu1 %v668_v31 }
 0x12e   :  { %622 = vmatprep.subr.bf16.mxu1 %v802_v0 }
 0x131   :  { %623 = vmatpush3.bf16.msra.mxu1 %v669_v32 }
 0x132   :  { %624 = vmatprep.subr.bf16.mxu1 %v802_v0 }
 0x135   :  { %625 = vmatpush3.bf16.msra.mxu1 %v670_v33 }
 0x136   :  { %626 = vmatprep.subr.bf16.mxu1 %v802_v0 }
 0x139   :  { %627 = vmatpush3.bf16.msra.mxu1 %v671_v34 }
 0x13a   :  { %628 = vmatprep.subr.bf16.mxu1 %v802_v0 }
 0x13d   :  { %629 = vmatpush3.bf16.msra.mxu1 %v672_v35 }
 0x13e   :  { %630 = vmatprep.subr.bf16.mxu1 %v802_v0 }
 0x141   :  { %631 = vmatpush3.bf16.msra.mxu1 %v673_v36 }
 0x142   :  { %632 = vmatprep.subr.bf16.mxu1 %v802_v0 }
 0x145   :  { %633 = vmatpush3.bf16.msra.mxu1 %v674_v47 }
 0x146   :  { %634 = vmatprep.subr.bf16.mxu1 %v802_v0 }
 0x149   :  { %635 = vmatpush3.bf16.msra.mxu1 %v675_v48 }
 0x1ff   :  { %v254_v38 = vpop.f32.mrb[0].mxu1 }
 0x200   :  { %v255_v39 = vadd.f32 %v517_v37, %v254_v38  ;;  %v598_v40 = vpop.f32.mrb[1].mxu1 }
 0x201   :  { %v257_v41 = vpop.f32.mrb[2].mxu1 }
 0x202   :  { %v258_v42 = vadd.f32 %v517_v37, %v257_v41  ;;  %v599_v43 = vpop.f32.mrb[3].mxu1  ;;  %v261_v44 = vmax.f32 %v255_v39, 0.0 }
 0x204   :  { %v262_v45 = vmax.f32 %v258_v42, 0.0 }
 0x206   :  { %v263_v46 = vpack.c.bf16 %v262_v45, %v261_v44 }
 0x208   :  { %617 = vmatmul.mubr.bf16.vlgmr.msra.gmra.mrb[4].mxu0 %v263_v46 }
 0x2db   :  { %v371_v50 = vpop.f32.mrb[4].mxu0 }
 0x2dc   :  { %v372_v51 = vadd.f32 %v527_v49, %v371_v50  ;;  %v618_v52 = vpop.f32.mrb[5].mxu0 }
 0x2dd   :  { %v374_v53 = vpop.f32.mrb[6].mxu0 }
 0x2de   :  { %v375_v54 = vadd.f32 %v527_v49, %v374_v53  ;;  %v619_v55 = vpop.f32.mrb[7].mxu0  ;;  %v378_v56 = vmax.f32 %v372_v51, 0.0 }
 0x2e0   :  { %v379_v57 = vmax.f32 %v375_v54, 0.0 }
 0x2e2   :  { %v380_v58 = vpack.c.bf16 %v379_v57, %v378_v56 }
 0x2e4   :  { %637 = vmatmul.mubr.bf16.vlgmr.msra.gmra.mrb[4].mxu1 %v380_v58 }
 0x3b7   :  { %v486_v60 = vpop.f32.mrb[4].mxu1 }
 0x3b8   :  { %v487_v61 = vadd.f32 %v536_v59, %v486_v60  ;;  %v638_v62 = vpop.f32.mrb[5].mxu1 }
 0x3b9   :  { %v489_v63 = vpop.f32.mrb[6].mxu1 }
 0x3ba   :  { %493 = vst [vmem:[#allocation10] sm:$0xff] %v487_v61  ;;  %v490_v0 = vadd.f32 %v536_v59, %v489_v63  ;;  %v639_v1 = vpop.f32.mrb[7].mxu1 }
 0x3bc   :  { %494 = vst [vmem:[#allocation10 + $0x8] sm:$0xff] %v490_v0 }
 0x3bd   :  { %775 = shalt.err (!%p772_p8)
}
 0x3be   :  { %s776_s17 = scalar_lea.hbm %s979_s7, 256 }
 0x3bf   :  { %p777_p9 = scmp.ne.s32.totalorder %s979_s7, %s776_s17  ;;  %p780_p10 = scmp.lt.u32.totalorder %s776_s17, %s979_s7 }
 0x3c1   :  { %p782_p11 = pnand %p780_p10, %p777_p9 }
 0x3c3   :  { %785 = shalt.err (!%p782_p11)
}
 0x3c4   :  { %506 = dma.vmem_to_hbm [thread:$0]  %s501_s14, 256, %s979_s7, [#allocation4], %s798_s1, %s798_s1, %s799_s25  }
 0x3c5   :  { %792 = dma.done.wait [#allocation4], 256  }
 0x3c6   :  { %793 = vsyncadd [#allocation4], 4294967040 }
 0x3c7   :  { %510 = vsyncpa [#allocation3], 1 }
 0x3c8   :  { %511 = vsyncpa [#allocation6], 1 }
 0x3c9   :  { %512 = vsyncpa [#allocation9], 1 }
 0x3ca   :  { %513 = vsyncpa [#allocation4], 1 }

</bundles_post_ra>
